<compile_context>
chip_gen: v5e
topology: v5e:2x2
jax: 0.10.0
libtpu: 0.0.40
codegen_flags: <defaults>
</compile_context>

<pallas_src>
import functools

import jax
import jax.numpy as jnp
from jax import lax
from jax.experimental import pallas as pl
from jax.experimental.pallas import tpu as pltpu


# ---------------------------------------------------------------------------
# helpers
# ---------------------------------------------------------------------------

def _round_up(v, m):
    return ((v + m - 1) // m) * m


def _choose_token_tile(n, tn_max):
    """Token tile: multiple of 8 sublanes, capped at tn_max, split into >= 2
    grid steps when the input is big enough (keeps both v7x TCs busy)."""
    tn = max(8, min(_round_up(tn_max, 8), _round_up(n, 8)))
    if _round_up(n, tn) // tn < 2 and n > 8:
        tn = max(8, _round_up(_round_up(n, 8) // 2, 8))
    return tn


# ---------------------------------------------------------------------------
# Fast path: VMEM-resident table, one-hot MXU gather
# ---------------------------------------------------------------------------

def _embed_onehot_kernel(ids_ref, table_ref, out_ref):
    # ids_ref:   (tn, 1)   int32  VMEM token-id tile
    # table_ref: (Vp, Ep)  float  VMEM (whole table, resident across the grid)
    # out_ref:   (tn, Ep)  float  VMEM output tile
    tok = ids_ref[...]                                        # (tn, 1)
    tn, _ = tok.shape
    vp = table_ref.shape[0]
    vocab_iota = lax.broadcasted_iota(jnp.int32, (tn, vp), 1)
    onehot = (tok == vocab_iota).astype(table_ref.dtype)      # (tn, Vp)
    out_ref[...] = jnp.dot(
        onehot, table_ref[...], preferred_element_type=jnp.float32
    ).astype(out_ref.dtype)


def _embed_small_vocab(ids, table, n, n_pad, tn, V, E, Vp, Ep):
    # TODO(synk): in a real model, build/cache the (Vp, Ep) padded table once at
    # init instead of padding on every forward call.
    table_p = table
    if (Vp, Ep) != (V, E):
        table_p = jnp.pad(table, ((0, Vp - V), (0, Ep - E)))
    ids_col = jnp.pad(ids, (0, n_pad - n)).reshape(n_pad, 1)

    out = pl.pallas_call(
        _embed_onehot_kernel,
        out_shape=jax.ShapeDtypeStruct((n_pad, Ep), table_p.dtype),
        grid_spec=pltpu.PrefetchScalarGridSpec(
            num_scalar_prefetch=0,
            grid=(n_pad // tn,),
            in_specs=[
                pl.BlockSpec((tn, 1), lambda i: (i, 0)),    # token-id tile
                pl.BlockSpec((Vp, Ep), lambda i: (0, 0)),   # whole table, resident
            ],
            out_specs=pl.BlockSpec((tn, Ep), lambda i: (i, 0)),
        ),
        compiler_params=pltpu.CompilerParams(
            dimension_semantics=("parallel",)),
        cost_estimate=pl.CostEstimate(
            flops=2 * n_pad * Vp * Ep,
            transcendentals=0,
            bytes_accessed=(Vp * Ep + 2 * n_pad * Ep)
            * jnp.dtype(table_p.dtype).itemsize),
    )(ids_col, table_p)
    return out[:n, :E]


# ---------------------------------------------------------------------------
# Fallback: HBM-resident table, per-row DMA gather straight into out_ref
# ---------------------------------------------------------------------------

def _embed_hbm_gather_kernel(tn, unroll, n_ref, ids_ref, table_hbm, out_ref, sems):
    # n_ref:     (1,)      int32  SMEM (scalar prefetch) -- number of valid tokens
    # ids_ref:   (n_pad,)  int32  SMEM (scalar prefetch) -- flattened token ids
    # table_hbm: (V, E)    float  HBM  (memory_space=pl.ANY)
    # out_ref:   (tn, E)   float  VMEM output tile (DMA landing area; no copy)
    # sems:      (tn,)     DMA semaphores, one per in-flight row copy
    base = pl.program_id(0) * tn
    n_valid = n_ref[0]

    def issue(j, carry):
        @pl.when(base + j < n_valid)           # skip dummy rows on the tail tile
        def _():
            tok = ids_ref[base + j]
            pltpu.make_async_copy(
                table_hbm.at[tok], out_ref.at[j], sems.at[j]).start()
        return carry

    def drain(j, carry):
        @pl.when(base + j < n_valid)
        def _():
            # Row 0 as src only gives .wait() a descriptor with the same
            # shape/byte-count as the issuing copy; the wait is on sems[j].
            pltpu.make_async_copy(
                table_hbm.at[0], out_ref.at[j], sems.at[j]).wait()
        return carry

    # Issue all row DMAs, then drain.  Unrolled so descriptor issue (the only
    # work in this kernel) co-issues instead of paying per-row loop overhead.
    lax.fori_loop(0, tn, issue, 0, unroll=unroll)
    lax.fori_loop(0, tn, drain, 0, unroll=unroll)


def _embed_hbm_gather(ids, table, n, n_pad, tn, V, E, *, unroll=8):
    # TODO(synk): for very long sequences (B*S >~ a few hundred thousand) the
    # flat SMEM-prefetched id array should be chunked per grid step instead.
    ids_pad = jnp.pad(ids, (0, n_pad - n))
    n_arr = jnp.array([n], dtype=jnp.int32)
    kernel = functools.partial(_embed_hbm_gather_kernel, tn, unroll)

    out = pl.pallas_call(
        kernel,
        out_shape=jax.ShapeDtypeStruct((n_pad, E), table.dtype),
        grid_spec=pltpu.PrefetchScalarGridSpec(
            num_scalar_prefetch=2,                         # n, ids -> SMEM
            grid=(n_pad // tn,),
            in_specs=[pl.BlockSpec(memory_space=pl.ANY)],  # table stays in HBM
            out_specs=pl.BlockSpec((tn, E), lambda i, n_s, ids_s: (i, 0)),
            scratch_shapes=[pltpu.SemaphoreType.DMA((tn,))],
        ),
        compiler_params=pltpu.CompilerParams(
            dimension_semantics=("parallel",)),
        cost_estimate=pl.CostEstimate(
            flops=0,
            transcendentals=0,
            bytes_accessed=2 * n_pad * E * jnp.dtype(table.dtype).itemsize
            + n_pad * 4),
    )(n_arr, ids_pad, table)
    return out[:n, :]


# ---------------------------------------------------------------------------
# Public wrapper (matches nn.Embedding forward semantics)
# ---------------------------------------------------------------------------

_SMALL_VOCAB = 512                     # one-hot MXU gather only pays off for small V
_VMEM_TABLE_BUDGET = 8 * 1024 * 1024   # keep the resident table well under VMEM


def embed_lookup(x, table, *, tn=128):
    """x: (B, S) int token ids; table: (V, E) float -> (B, S, E) float."""
    B, S = x.shape
    V, E = table.shape
    n = B * S

    # Clamp ids so a bad token can never become an out-of-bounds DMA / gather.
    # TODO(synk): PyTorch nn.Embedding raises on out-of-range ids; here they clamp.
    ids = jnp.clip(x.reshape(n).astype(jnp.int32), 0, V - 1)

    tn = _choose_token_tile(n, tn)
    n_pad = _round_up(n, tn)

    Vp = _round_up(V, 128)   # MXU-native contraction dim (also correct for v5e)
    Ep = _round_up(E, 128)   # lane-dense output stores on the matmul path
    itemsize = jnp.dtype(table.dtype).itemsize

    if V <= _SMALL_VOCAB and Vp * Ep * itemsize <= _VMEM_TABLE_BUDGET:
        out = _embed_small_vocab(ids, table, n, n_pad, tn, V, E, Vp, Ep)
    else:
        # TODO(synk): a mid-size regime (table fits VMEM but V > 512) could use
        # VMEM-resident dynamic row reads instead of per-row HBM DMAs.
        out = _embed_hbm_gather(ids, table, n, n_pad, tn, V, E)

    return out.reshape(B, S, E)


# ---------------------------------------------------------------------------
# Demo / self-test
# ---------------------------------------------------------------------------

if __name__ == "__main__":
    # Synthetic "text" to derive the vocab, mirroring the original script.
    text = "hello pallas tpu kernels! the quick brown fox jumps over the lazy dog."
    chars = sorted(list(set(text)))
    vocab_size = len(chars)
    embed_dim = 50

    key = jax.random.PRNGKey(0)
    k_table, k_idx, k_table2, k_idx2 = jax.random.split(key, 4)

    # nn.Embedding default init ~ N(0, 1); deterministic in-script init.
    table = jax.random.normal(k_table, (vocab_size, embed_dim), dtype=jnp.float32)
    B, S = 2, 8
    x = jax.random.randint(k_idx, (B, S), 0, vocab_size, dtype=jnp.int32)

    out = jax.block_until_ready(embed_lookup(x, table))
    ref = table[x]
    assert out.shape == (B, S, embed_dim)
    assert jnp.allclose(out, ref), "fast path (VMEM one-hot gather) mismatch"

    # Also exercise the large-vocab HBM-DMA fallback path (multi-tile grid with
    # a partial tail tile).
    V2, E2 = 1000, embed_dim
    table2 = jax.random.normal(k_table2, (V2, E2), dtype=jnp.float32)
    B2, S2 = 2, 300
    x2 = jax.random.randint(k_idx2, (B2, S2), 0, V2, dtype=jnp.int32)

    out2 = jax.block_until_ready(embed_lookup(x2, table2))
    ref2 = table2[x2]
    assert out2.shape == (B2, S2, E2)
    assert jnp.allclose(out2, ref2), "fallback (HBM DMA row gather) mismatch"

    print("KERNEL_OK")
</pallas_src>

<mosaic_0001>
module attributes {stable_mosaic.version = 11 : i64} {
  func.func @_embed_onehot_kernel(%arg0: i32, %arg1: memref<8x1xi32, #tpu.memory_space<vmem>>, %arg2: memref<128x128xf32, #tpu.memory_space<vmem>>, %arg3: memref<8x128xf32, #tpu.memory_space<vmem>>) attributes {dimension_semantics = [#tpu.dimension_semantics<parallel>], iteration_bounds = array<i64: 2>, scalar_prefetch = 0 : i64, scratch_operands = 0 : i64, tpu.core_type = #tpu.core_type<tc>, window_params = [{transform_indices = @transform_0, window_bounds = array<i64: 8, 1>}, {pipeline_mode = #tpu.pipeline_mode<synchronous>, transform_indices = @transform_1, window_bounds = array<i64: 128, 128>}, {transform_indices = @transform_2, window_bounds = array<i64: 8, 128>}]} {
    %c0 = arith.constant 0 : index
    %c0_0 = arith.constant 0 : index
    %0 = vector.load %arg1[%c0, %c0_0] : memref<8x1xi32, #tpu.memory_space<vmem>>, vector<8x1xi32>
    %1 = tpu.iota {dimensions = array<i32: 1>} : vector<8x128xi32>
    %2 = vector.broadcast %0 : vector<8x1xi32> to vector<8x128xi32>
    %3 = arith.cmpi eq, %2, %1 : vector<8x128xi32>
    %4 = arith.extui %3 : vector<8x128xi1> to vector<8x128xi32>
    %5 = arith.sitofp %4 : vector<8x128xi32> to vector<8x128xf32>
    %c0_1 = arith.constant 0 : index
    %c0_2 = arith.constant 0 : index
    %6 = vector.load %arg2[%c0_1, %c0_2] : memref<128x128xf32, #tpu.memory_space<vmem>>, vector<128x128xf32>
    %cst = arith.constant dense<0.000000e+00> : vector<8x128xf32>
    %7 = tpu.matmul %5, %6, %cst {dimension_numbers = #tpu.dot_dimension_numbers<[1], [0], [0], [1], [0, 0, 1, 1], [], []>} : vector<8x128xf32>, vector<128x128xf32>, vector<8x128xf32> -> vector<8x128xf32>
    %c0_3 = arith.constant 0 : index
    %c0_4 = arith.constant 0 : index
    %8 = vector.load %arg3[%c0_3, %c0_4] : memref<8x128xf32, #tpu.memory_space<vmem>>, vector<8x128xf32>
    tpu.vector_store %arg3[%c0_3, %c0_4], %7 {strides = array<i32>} : memref<8x128xf32, #tpu.memory_space<vmem>>, vector<8x128xf32>,
    return
  }
  func.func @transform_0(%arg0: i32) -> (i32, i32) {
    %c0_i32 = arith.constant 0 : i32
    %c0_i32_0 = arith.constant 0 : i32
    return %arg0, %c0_i32 : i32, i32
  }
  func.func @transform_1(%arg0: i32) -> (i32, i32) {
    %c0_i32 = arith.constant 0 : i32
    %c0_i32_0 = arith.constant 0 : i32
    %c0_i32_1 = arith.constant 0 : i32
    return %c0_i32, %c0_i32_0 : i32, i32
  }
  func.func @transform_2(%arg0: i32) -> (i32, i32) {
    %c0_i32 = arith.constant 0 : i32
    %c0_i32_0 = arith.constant 0 : i32
    return %arg0, %c0_i32 : i32, i32
  }
}

</mosaic_0001>

<bundles_post_ra>
// kernel: tpu_custom_call.1
= control target key start
LH: loop header
LB: loop body
LE: loop exit
PB: predicated region body
PF: predicated region fallthrough
CT: control target
= control target key end

     0   :  { %7 = vsyncpa [#allocation3], 0  ;;  %s571_s0 = inlined_call_operand.vmem [shape: s32[16,1], index: 0, kind: input, shape index: {}]   ;;  %s572_s1 = inlined_call_operand.hbm [shape: f32[128,128], index: 1, kind: input, shape index: {}]   ;;  %s573_s2 = inlined_call_operand.hbm [shape: f32[16,128], index: 2, kind: output, shape index: {}]  }
   0x1   :  { %8 = vsyncpa [#allocation4], 0 }
   0x2   :  { %10 = vsyncpa [#allocation4 + $0x1], 0  ;;  %s476_s9 = smov 0   ;;  %s478_s10 = smov 0  }
   0x3   :  { %s480_s11 = smov 0   ;;  %s482_s12 = smov 0  }
   0x4 LB: > { %s497_s13 = sadd.s32 4294967295, %s454_s12   ;;  %s289_s14 = sadd.s32 4294967294, %s454_s12   ;;  %s454_s12 = sphi %s482_s12, %s579_s12   ;;  %s450_s11 = sphi %s480_s11, %s578_s11   ;;  %s446_s10 = sphi %s478_s10, %s577_s10   ;;  %s442_s9 = sphi %s476_s9, %s576_s9  }
   0x5   : > { %s501_s15 = sadd.s32 1, %s454_s12   ;;  %s70_s16 = sadd.s32 1, %s450_s11 }
   0x6   : > { %s67_s17 = ssub.s32 %s454_s12, %s501_s15  ;;  %p80_p0 = scmp.ne.s32.totalorder %s450_s11, %s446_s10 }
   0x7   : > { %p68_p1 = scmp.eq.s32.totalorder %s67_s17, 0  ;;  %p81_p2 = scmp.eq.s32.totalorder %s497_s13, 1 }
   0x8   : > { %p86_p3 = scmp.ne.s32.totalorder %s446_s10, %s442_s9  ;;  %p87_p4 = scmp.eq.s32.totalorder %s289_s14, 1 }
   0x9   : > { %s512_s18 = scalar_select %p68_p1, %s450_s11, %s70_s16  }
   0xa   : > { %p514_p5 = por %p81_p2, %p80_p0  ;;  %p518_p6 = por %p87_p4, %p86_p3 }
   0xb   : > { %p290_p7 = scmp.ge.s32.totalorder %s454_s12, 1  ;;  %p94_p8 = scmp.lt.s32.totalorder %s454_s12, 3 }
   0xc   : > { %p317_p9 = scmp.eq.s32.totalorder %s497_s13, 0  ;;  %s105_s23 = sshll.u32 %s572_s1, 4  ;;  %s106_s23 = int_to_ptr.hbm [resolvable:$true] %s105_s23 }
   0xd   : > { %p95_p10 = pnand %p290_p7, %p94_p8  ;;  %s456_s24 = smov [#allocation2]  }
   0xe   : > { %s107_s25 = sshll.u32 %s456_s24, 4  ;;  %s457_s26 = smov 128   ;;  %s108_s25 = int_to_ptr.vmem [resolvable:$true] %s107_s25 }
   0xf   : > { %p309_p11 = pneg %p95_p10  ;;  %s458_s27 = smov 8  }
  0x10   : > { %130 = sbr.rel (%p95_p10) target bundleno = 274 (0x112), region = 28 }
  0x11   : > { %p310_p12 = pnand %p317_p9, %p309_p11 }
  0x13   : > { %312 = dma.hbm_to_vmem [thread:$0]  (!%p310_p12), %s106_s23, 2048, %s108_s25, [#allocation3], %s457_s26, %s457_s26, %s458_s27  }
  0x15   : > { %433 = dma.done.wait (%p317_p9), [#allocation3], 2048  }
  0x16   : > { %435 = vsyncadd (%p317_p9), [#allocation3], 4294965248  ;;  %p152_p13 = scmp.lt.s32.totalorder %s497_s13, 1  ;;  %v459_v0 = vmov 0   ;;  %v180_v2 = vld [vmem:[#allocation2 + $0x78] sm:$0xff]  ;;  %v179_v3 = vld [vmem:[#allocation2 + $0x70] sm:$0xff]  ;;  %v157_v18 = vlaneseq }
  0x17   : > { %357 = vset.pattern.permute.xlu0 %v459_v0  ;;  %181 = vmatpush.msra.mxu0 %v180_v2  ;;  %v178_v4 = vld [vmem:[#allocation2 + $0x68] sm:$0xff]  ;;  %v177_v5 = vld [vmem:[#allocation2 + $0x60] sm:$0xff]  ;;  %v176_v6 = vld [vmem:[#allocation2 + $0x58] sm:$0xff]  ;;  %v460_v21 = vmov 1.0   ;;  %s149_s5 = sand.u32 1, %s446_s10   ;;  %s300_s7 = sshll.u32 %s497_s13, 3 }
  0x18   : > { %s153_s28 = scalar_select %p152_p13, %s497_s13, 1  ;;  %v175_v7 = vld [vmem:[#allocation2 + $0x50] sm:$0xff]  ;;  %v174_v8 = vld [vmem:[#allocation2 + $0x48] sm:$0xff]  ;;  %v173_v9 = vld [vmem:[#allocation2 + $0x40] sm:$0xff]  ;;  %v158_v19 = vand.u32 127, %v157_v18 }
  0x19   : > { %182 = vmatpush.msra.mxu0 %v179_v3  ;;  %v172_v10 = vld [vmem:[#allocation2 + $0x38] sm:$0xff]  ;;  %v171_v11 = vld [vmem:[#allocation2 + $0x30] sm:$0xff]  ;;  %v170_v12 = vld [vmem:[#allocation2 + $0x28] sm:$0xff]  ;;  %s295_s6 = sshll.u32 %s149_s5, 3  ;;  %s213_s16 = scalar_lea.hbm %s573_s2, %s300_s7 }
  0x1a   : > { %s296_s29 = sshll.u32 %s153_s28, 3  ;;  %v169_v13 = vld [vmem:[#allocation2 + $0x20] sm:$0xff]  ;;  %v168_v14 = vld [vmem:[#allocation2 + $0x18] sm:$0xff]  ;;  %v167_v15 = vld [vmem:[#allocation2 + $0x10] sm:$0xff]  ;;  %s151_s17 = scalar_lea.vmem [#allocation5], %s295_s6 }
  0x1b   : > { %s155_s4 = scalar_lea.vmem %s571_s0, %s296_s29  ;;  %183 = vmatpush.msra.mxu0 %v178_v4  ;;  %v166_v16 = vld [vmem:[#allocation2 + $0x8] sm:$0xff]  ;;  %v165_v17 = vld [vmem:[#allocation2] sm:$0xff]  ;;  %s215_s21 = sshll.u32 %s151_s17, 4  ;;  %s216_s21 = int_to_ptr.vmem [resolvable:$true] %s215_s21 }
  0x1c   : > { %v156_v1 = vld [vmem:[%s155_s4] sm:$0xff]  ;;  %s217_s22 = sshll.u32 %s213_s16, 4  ;;  %s203_s23 = scalar_lea.sflag [#allocation4], %s149_s5  ;;  %s218_s22 = int_to_ptr.hbm [resolvable:$true] %s217_s22 }
  0x1d   : > { %160 = vperm.xlu0 %357, %v156_v1   ;;  %184 = vmatpush.msra.mxu0 %v177_v5  ;;  %s402_s24 = sshra.s32 %s218_s22, 4  ;;  %s408_s27 = scalar_lea.hbm %s573_s2, 16  ;;  %s403_s24 = int_to_ptr.hbm [resolvable:$true] %s402_s24 }
  0x1e   : > { %s404_s25 = scalar_lea.hbm %s403_s24, 8  ;;  %p409_p3 = scmp.lt.s32.totalorder %s403_s24, %s573_s2 }
  0x1f   : > { %185 = vmatpush.msra.mxu0 %v176_v6  ;;  %p405_p0 = scmp.ne.s32.totalorder %s403_s24, %s404_s25  ;;  %p410_p4 = scmp.lt.s32.totalorder %s408_s27, %s404_s25 }
  0x21   : > { %186 = vmatpush.msra.mxu0 %v175_v7  ;;  %p406_p1 = pnand %p405_p0, %p514_p5  ;;  %p411_p7 = por %p410_p4, %p409_p3 }
  0x23   : > { %187 = vmatpush.msra.mxu0 %v174_v8  ;;  %p407_p2 = pneg %p406_p1 }
  0x25   : > { %188 = vmatpush.msra.mxu0 %v173_v9  ;;  %p412_p8 = pnand %p411_p7, %p407_p2 }
  0x27   : > { %189 = vmatpush.msra.mxu0 %v172_v10 }
  0x29   : > { %190 = vmatpush.msra.mxu0 %v171_v11 }
  0x2b   : > { %191 = vmatpush.msra.mxu0 %v170_v12 }
  0x2d   : > { %192 = vmatpush.msra.mxu0 %v169_v13 }
  0x2f   : > { %193 = vmatpush.msra.mxu0 %v168_v14 }
  0x31   : > { %194 = vmatpush.msra.mxu0 %v167_v15 }
  0x33   : > { %195 = vmatpush.msra.mxu0 %v166_v16 }
  0x35   : > { %196 = vmatpush.msra.mxu0 %v165_v17 }
  0x8f   : > { %v161_v20 = vpop.permute.xlu0 %160 }
  0x90   : > { %vm162_vm0 = vcmp.eq.s32.totalorder %v161_v20, %v158_v19 }
  0x91   : > { %298 = vmatmul.msk.f32.vlgmr.msra.gmra.mxu0 %vm162_vm0, %v460_v21 }
 0x10e   : > { %v198_v22 = vpop.f32.mrf.mxu0 }
 0x10f   : > { %201 = vst [vmem:[%s151_s17] sm:$0xff] %v198_v22 }
 0x110   : > { %415 = shalt.err (!%p412_p8)
}
 0x111   : > { %307 = dma.vmem_to_hbm [thread:$0]  (%p514_p5), %s216_s21, 128, %s218_s22, %s203_s23  }
 0x112 PF: > { %p319_p9 = scmp.ge.s32.totalorder %s454_s12, 2  ;;  %s229_s30 = sand.u32 1, %s442_s9  }
 0x113   : > { %s230_s3 = scalar_lea.sflag [#allocation4], %s229_s30 }
 0x114   : > { %p314_p10 = pnand %p319_p9, %p518_p6 }
 0x116   : > { %p315_p11 = pneg %p314_p10 }
 0x118   : > { %437 = dma.done.wait (%p315_p11), %s230_s3, 128  }
 0x119   : > { %439 = vsyncadd (%p315_p11), %s230_s3, 4294967168  ;;  %p13_p12 = scmp.ge.s32.totalorder %s501_s15, 4   ;;  %s576_s9 = smov %s446_s10 }
 0x11a   : > { %s577_s10 = smov %s450_s11  ;;  %s578_s11 = smov %s512_s18 }
 0x11b   : > { %s579_s12 = smov %s501_s15  ;;  %15 = sbr.rel (!%p13_p12) target bundleno = 4 (0x4), region = 68 }
 0x120   :  { %236 = vsyncpa [#allocation3], 1 }
 0x121   :  { %238 = vsyncpa [#allocation3 + $0x1], 1 }
 0x122   :  { %239 = vsyncpa [#allocation4], 1 }
 0x123   :  { %241 = vsyncpa [#allocation4 + $0x1], 1 }

</bundles_post_ra>
